<compile_context>
chip_gen: v7x
topology: tpu7x:2x2x1
jax: 0.10.0
libtpu: 0.0.40
codegen_flags: <defaults>
</compile_context>

<pallas_src>
import functools

import jax
import jax.numpy as jnp
import numpy as np
from jax import lax
from jax.experimental import pallas as pl
from jax.experimental.pallas import tpu as pltpu


# ------------------------------ Pallas kernels ------------------------------

def _stage1_kernel(x_ref, w_ref, o_ref, *, ksp, wp, lq):
    """Upsampling complex conv (kernel (1,ksp,ksp)) on one (b, t) slab, flat-spatial layout.

    x_ref: [1, 1, C2IN, LFLAT]    zero-padded, dilated input with (H, W) flattened (bf16)
    w_ref: [ksp*ksp, C2OUT, C2IN] per-tap complex 2x2 block weights, left-multiply (bf16)
    o_ref: [1, 1, C2OUT, LQ]      conv over the full padded width; invalid columns are cropped
                                  outside the kernel (bf16)
    """
    c2o = w_ref.shape[1]
    acc = jnp.zeros((c2o, lq), jnp.float32)
    tap = 0
    for dh in range(ksp):                      # static unroll; each tap = contiguous flat slice
        for dw in range(ksp):
            shift = dh * wp + dw
            acc = acc + jnp.dot(w_ref[tap], x_ref[0, 0, :, shift:shift + lq],
                                preferred_element_type=jnp.float32)
            tap += 1
    o_ref[0, 0] = acc.astype(o_ref.dtype)


def _stage2_kernel(*refs, kt, ksp, psp, wp, lq):
    """Fused conv_xt (kt,1,ksp) + conv_yt (kt,ksp,1) + cPReLU on one (b, t) output slab.

    refs = (x_0 .. x_{kt-1}, w_ref, alpha_ref, o_ref)
      x_dt:  [1, 1, C2INT, LFLAT]    padded stage-1 output, T-slice t+dt, flat spatial (bf16)
      w_ref: [2*kt*ksp, C2OUT, C2INT] per-tap complex block weights, left-multiply (bf16)
      alpha: [C2OUT, 1]               cPReLU slope, rows packed [re | im | 0-pad] (f32)
      o_ref: [1, C2OUT, LQ]           (f32)
    """
    x_refs = refs[:kt]
    w_ref, a_ref, o_ref = refs[kt], refs[kt + 1], refs[kt + 2]
    c2o = w_ref.shape[1]
    acc = jnp.zeros((c2o, lq), jnp.float32)
    tap = 0
    for dt in range(kt):
        x = x_refs[dt]
        for dw in range(ksp):                  # conv_xt branch: dh fixed at psp, dw varies
            shift = psp * wp + dw
            acc = acc + jnp.dot(w_ref[tap], x[0, 0, :, shift:shift + lq],
                                preferred_element_type=jnp.float32)
            tap += 1
        for dh in range(ksp):                  # conv_yt branch: dw fixed at psp, dh varies
            shift = dh * wp + psp
            acc = acc + jnp.dot(w_ref[tap], x[0, 0, :, shift:shift + lq],
                                preferred_element_type=jnp.float32)
            tap += 1
    a = a_ref[...]                              # (C2OUT, 1), broadcasts along lanes
    o_ref[0] = jnp.where(acc >= 0, acc, a * acc).astype(o_ref.dtype)


def _stage1_call(xf, w1, *, ksp, wp, lq):
    b, t, c2i, lf = xf.shape
    ntaps, c2o, _ = w1.shape
    kernel = functools.partial(_stage1_kernel, ksp=ksp, wp=wp, lq=lq)
    return pl.pallas_call(
        kernel,
        out_shape=jax.ShapeDtypeStruct((b, t, c2o, lq), jnp.bfloat16),
        grid_spec=pltpu.PrefetchScalarGridSpec(
            num_scalar_prefetch=0,
            grid=(b, t),
            in_specs=[
                pl.BlockSpec((1, 1, c2i, lf), lambda bi, ti: (bi, ti, 0, 0)),
                pl.BlockSpec((ntaps, c2o, c2i), lambda bi, ti: (0, 0, 0)),
            ],
            out_specs=pl.BlockSpec((1, 1, c2o, lq), lambda bi, ti: (bi, ti, 0, 0)),
        ),
        compiler_params=pltpu.CompilerParams(
            dimension_semantics=("parallel", "parallel"),
            vmem_limit_bytes=32 * 1024 * 1024),
    )(xf, w1)


def _stage2_call(spf, w2, alpha_pk, *, t, kt, ksp, psp, wp, lq):
    b, t_pad, c2i, lf = spf.shape
    ntaps, c2o, _ = w2.shape
    kernel = functools.partial(_stage2_kernel, kt=kt, ksp=ksp, psp=psp, wp=wp, lq=lq)
    # kt specs over the SAME padded array, offset by dt along T: T halo without materializing
    # taps in HBM.  TODO(synk): a manual rolling T-halo (pl.ANY + make_async_copy ring) would
    # cut stage-2 input HBM reads another ~kt x.
    x_specs = [
        pl.BlockSpec((1, 1, c2i, lf), (lambda bi, ti, dt=dt: (bi, ti + dt, 0, 0)))
        for dt in range(kt)
    ]
    in_specs = x_specs + [
        pl.BlockSpec((ntaps, c2o, c2i), lambda bi, ti: (0, 0, 0)),
        pl.BlockSpec((c2o, 1), lambda bi, ti: (0, 0)),
    ]
    return pl.pallas_call(
        kernel,
        out_shape=jax.ShapeDtypeStruct((b, c2o, t * lq), jnp.float32),
        grid_spec=pltpu.PrefetchScalarGridSpec(
            num_scalar_prefetch=0,
            grid=(b, t),
            in_specs=in_specs,
            out_specs=pl.BlockSpec((1, c2o, lq), lambda bi, ti: (bi, 0, ti)),
        ),
        compiler_params=pltpu.CompilerParams(
            dimension_semantics=("parallel", "parallel"),
            vmem_limit_bytes=32 * 1024 * 1024),
    )(*([spf] * kt), w2, alpha_pk)


# ------------------------------ plain-JAX glue ------------------------------

def _round_up(x, m):
    return ((x + m - 1) // m) * m


def _dilate_hw(x, s):
    """Insert (s-1) zeros between pixels in H and W (layout [B, T, C, H, W])."""
    if s == 1:
        return x
    b, t, c, h, w = x.shape
    y = jnp.zeros((b, t, c, (h - 1) * s + 1, (w - 1) * s + 1), x.dtype)
    return y.at[:, :, :, ::s, ::s].set(x)


def _cplx_block_left(wr, wi):
    """[Cin, Cout] real/imag weights -> [2*Cout, 2*Cin] left-multiply block so that
    block @ [xr ; xi] = [wr^T xr - wi^T xi ; wi^T xr + wr^T xi]."""
    top = jnp.concatenate([wr.T, -wi.T], axis=1)
    bot = jnp.concatenate([wi.T, wr.T], axis=1)
    return jnp.concatenate([top, bot], axis=0)


def _pad_block(blk, rows, cols):
    return jnp.pad(blk, ((0, rows - blk.shape[0]), (0, cols - blk.shape[1])))


# ------------------------------- the module ---------------------------------

class ComplexSplitFastUpsamplingPallas:
    """Pallas realization of ComplexConvBlock3dUpsampling's forward pass (split-fast
    transposed-conv variant):

    conv_xy : complex transposed conv, Cin -> Cinter, kernel (1,ksp,ksp), stride (1,s,s)
    conv_xt : complex conv,            Cinter -> Cout, kernel (kt,1,ksp), 'same' pad
    conv_yt : complex conv,            Cinter -> Cout, kernel (kt,ksp,1), 'same' pad
    norm    : 'no' (identity);  act: cPReLU (PReLU on real & imag, shared per-channel slope)
    """

    def __init__(self, in_channels, inter_channels, out_channels, kernel_size_sp=3,
                 kernel_size_t=3, stride=1, bias=False, key=None):
        del inter_channels, bias  # inter_channels recomputed (as in the PyTorch module); bias=False
        nom = kernel_size_sp ** 2 * kernel_size_t * in_channels * out_channels
        denom = kernel_size_sp ** 2 * in_channels + 2 * kernel_size_sp * kernel_size_t * out_channels
        inter = int(np.floor(nom / denom))

        self.in_channels = in_channels
        self.out_channels = out_channels
        self.inter_channels = inter
        self.ksp = kernel_size_sp
        self.kt = kernel_size_t
        self.stride = stride

        if key is None:
            key = jax.random.PRNGKey(0)
        ks = jax.random.split(key, 6)

        def init(k, shape, fan_in):
            lim = 1.0 / np.sqrt(fan_in)
            return jax.random.uniform(k, shape, jnp.float32, -lim, lim)

        ksp, kt = kernel_size_sp, kernel_size_t
        # conv_xy (transposed conv) weight, conv_transpose3d layout [Cin, Cinter, 1, ksp, ksp]
        fan_xy = in_channels * ksp * ksp
        self.w_xy_re = init(ks[0], (in_channels, inter, 1, ksp, ksp), fan_xy)
        self.w_xy_im = init(ks[1], (in_channels, inter, 1, ksp, ksp), fan_xy)
        # conv_xt / conv_yt weights, conv3d layout [Cout, Cinter, kT, kH, kW]
        fan_sp = inter * kt * ksp
        self.w_xt_re = init(ks[2], (out_channels, inter, kt, 1, ksp), fan_sp)
        self.w_xt_im = init(ks[3], (out_channels, inter, kt, 1, ksp), fan_sp)
        self.w_yt_re = init(ks[4], (out_channels, inter, kt, ksp, 1), fan_sp)
        self.w_yt_im = init(ks[5], (out_channels, inter, kt, ksp, 1), fan_sp)
        # cPReLU slope (PyTorch nn.PReLU default init 0.25), shared between real/imag parts
        self.alpha = jnp.full((out_channels,), 0.25, jnp.float32)
        # TODO(synk): merlinth PadConv zero-mean / norm-bound weight projection not replicated
        #             (parameterization detail, does not change the forward math given weights).

    # ---- shared glue ----
    def _stage1_prepad(self, a, h_out, w_out):
        """conv_transpose -> dilated input + zero padding for a VALID conv with flipped weights.

        a: [B, T, C2, H, W] -> [B, T, C2, Hp1, Wp1]
        """
        _, _, _, h, w = a.shape
        s, ksp = self.stride, self.ksp
        p = ksp // 2
        op_h = h_out - ((h - 1) * s - 2 * p + ksp)
        op_w = w_out - ((w - 1) * s - 2 * p + ksp)
        assert 0 <= op_h < max(s, 1) and 0 <= op_w < max(s, 1), \
            "output_shape incompatible with stride"
        lo = ksp - 1 - p
        pads = ((0, 0), (0, 0), (0, 0), (lo, lo + op_h), (lo, lo + op_w))
        # TODO(synk): stride>1 zero-insertion still multiplies (s^2-1)/s^2 zeros in stage 1;
        #             a sub-pixel phase-split decomposition would remove those FLOPs and the
        #             ~s^2 x dilated-input DMA.
        return jnp.pad(_dilate_hw(a, s), pads)

    # ------------------------------ forward ----------------------------------
    def __call__(self, x, output_shape):
        b, cin, t, h, w = x.shape
        assert cin == self.in_channels
        h_out, w_out = int(output_shape[-2]), int(output_shape[-1])
        ksp, kt = self.ksp, self.kt
        psp, pt = ksp // 2, kt // 2
        cint, cout = self.inter_channels, self.out_channels
        c2in = _round_up(2 * cin, 8)      # packed [re | im | 0-pad] channel dims, sublane aligned
        c2int = _round_up(2 * cint, 8)
        c2out = _round_up(2 * cout, 8)

        # pack channels [re | im | 0-pad], layout [B, T, C2, H, W], bf16 operands / f32 accum
        xr = jnp.real(x).astype(jnp.float32)
        xi = jnp.imag(x).astype(jnp.float32)
        zc = jnp.zeros((b, c2in - 2 * cin, t, h, w), jnp.float32)
        xpk = jnp.concatenate([xr, xi, zc], axis=1)                 # [B, C2in, T, H, W]
        xpk = jnp.transpose(xpk, (0, 2, 1, 3, 4)).astype(jnp.bfloat16)

        # ---- stage 1: ComplexPadConvScaleTranspose3D (Cin -> Cinter, upsample H,W) ----
        xp = self._stage1_prepad(xpk, h_out, w_out)                 # [B, T, C2in, Hp1, Wp1]
        hp1, wp1 = xp.shape[-2], xp.shape[-1]
        lq1 = _round_up(h_out * wp1, 128)                           # lane-dense output length
        lflat1 = (ksp - 1) * wp1 + (ksp - 1) + lq1                  # covers the largest tap shift
        xf = xp.reshape(b, t, c2in, hp1 * wp1)
        xf = jnp.pad(xf, ((0, 0), (0, 0), (0, 0), (0, lflat1 - hp1 * wp1)))

        # effective (flipped, transposed) per-tap left-multiply blocks: [ksp*ksp, C2int, C2in]
        w1 = jnp.stack([
            _pad_block(_cplx_block_left(self.w_xy_re[:, :, 0, ksp - 1 - dh, ksp - 1 - dw],
                                        self.w_xy_im[:, :, 0, ksp - 1 - dh, ksp - 1 - dw]),
                       c2int, c2in)
            for dh in range(ksp) for dw in range(ksp)], 0).astype(jnp.bfloat16)

        s1 = _stage1_call(xf, w1, ksp=ksp, wp=wp1, lq=lq1)          # [B, T, C2int, LQ1] bf16

        # ---- stage 2: conv_xt + conv_yt + cPReLU, fused into one kernel ----
        # crop the over-computed columns (w >= w_out) and 'same'-pad for the second stage
        s1v = s1[:, :, :, :h_out * wp1].reshape(b, t, c2int, h_out, wp1)[..., :w_out]
        # TODO(synk): verify merlinth PadConv padding mode; 'symmetric' kept from v2
        #             (torch Conv3d(padding='same') would be zero padding).
        spp = jnp.pad(s1v, ((0, 0), (pt, pt), (0, 0), (psp, psp), (psp, psp)), mode='symmetric')
        hp2, wp2 = h_out + 2 * psp, w_out + 2 * psp
        lq2 = _round_up(h_out * wp2, 128)
        lflat2 = max((ksp - 1) * wp2 + psp, psp * wp2 + ksp - 1) + lq2
        spf = spp.reshape(b, t + 2 * pt, c2int, hp2 * wp2)
        spf = jnp.pad(spf, ((0, 0), (0, 0), (0, 0), (0, lflat2 - hp2 * wp2)))

        w2_blocks = []
        for dt in range(kt):
            for dw in range(ksp):                                   # conv_xt taps (dt, psp, dw)
                w2_blocks.append(_pad_block(
                    _cplx_block_left(self.w_xt_re[:, :, dt, 0, dw].T,
                                     self.w_xt_im[:, :, dt, 0, dw].T), c2out, c2int))
            for dh in range(ksp):                                   # conv_yt taps (dt, dh, psp)
                w2_blocks.append(_pad_block(
                    _cplx_block_left(self.w_yt_re[:, :, dt, dh, 0].T,
                                     self.w_yt_im[:, :, dt, dh, 0].T), c2out, c2int))
        w2 = jnp.stack(w2_blocks, 0).astype(jnp.bfloat16)
        alpha_pk = jnp.concatenate(
            [self.alpha, self.alpha, jnp.zeros((c2out - 2 * cout,), jnp.float32)]
        ).reshape(c2out, 1)

        out = _stage2_call(spf, w2, alpha_pk, t=t, kt=kt, ksp=ksp, psp=psp, wp=wp2, lq=lq2)

        # out: [B, C2out, T*LQ2] f32, already channel-major -> only crops + re/im combine left
        outv = out.reshape(b, c2out, t, lq2)[:, :, :, :h_out * wp2]
        outv = outv.reshape(b, c2out, t, h_out, wp2)[..., :w_out]
        return (outv[:, :cout] + 1j * outv[:, cout:2 * cout]).astype(jnp.complex64)


# --------------------------- pure-lax reference ------------------------------

def forward_reference(mod, x, output_shape):
    h_out, w_out = int(output_shape[-2]), int(output_shape[-1])
    ksp, kt, s = mod.ksp, mod.kt, mod.stride
    psp, pt = ksp // 2, kt // 2

    xr = jnp.transpose(jnp.real(x), (0, 2, 3, 4, 1)).astype(jnp.float32)   # [B,T,H,W,C]
    xi = jnp.transpose(jnp.imag(x), (0, 2, 3, 4, 1)).astype(jnp.float32)

    def dilate(a):
        if s == 1:
            return a
        b_, t_, h_, w_, c_ = a.shape
        y = jnp.zeros((b_, t_, (h_ - 1) * s + 1, (w_ - 1) * s + 1, c_), a.dtype)
        return y.at[:, :, ::s, ::s, :].set(a)

    def prepad1(a):
        _, _, h_, w_, _ = a.shape
        p = ksp // 2
        op_h = h_out - ((h_ - 1) * s - 2 * p + ksp)
        op_w = w_out - ((w_ - 1) * s - 2 * p + ksp)
        lo = ksp - 1 - p
        return jnp.pad(dilate(a), ((0, 0), (0, 0), (lo, lo + op_h), (lo, lo + op_w), (0, 0)))

    def prepad2(a):
        return jnp.pad(a, ((0, 0), (pt, pt), (psp, psp), (psp, psp), (0, 0)), mode='symmetric')

    dn = ('NDHWC', 'DHWIO', 'NDHWC')
    conv = lambda a, k: lax.conv_general_dilated(
        a, k, (1, 1, 1), 'VALID', dimension_numbers=dn, precision=lax.Precision.HIGHEST)

    # stage 1
    xr_p, xi_p = prepad1(xr), prepad1(xi)
    k1_re = jnp.flip(mod.w_xy_re, axis=(3, 4)).transpose(2, 3, 4, 0, 1)
    k1_im = jnp.flip(mod.w_xy_im, axis=(3, 4)).transpose(2, 3, 4, 0, 1)
    sp_re = conv(xr_p, k1_re) - conv(xi_p, k1_im)
    sp_im = conv(xr_p, k1_im) + conv(xi_p, k1_re)

    # stage 2
    sp_re_p, sp_im_p = prepad2(sp_re), prepad2(sp_im)
    kxt_re = mod.w_xt_re.transpose(2, 3, 4, 1, 0)
    kxt_im = mod.w_xt_im.transpose(2, 3, 4, 1, 0)
    kyt_re = mod.w_yt_re.transpose(2, 3, 4, 1, 0)
    kyt_im = mod.w_yt_im.transpose(2, 3, 4, 1, 0)
    ar_h, ai_h = sp_re_p[:, :, psp:psp + h_out, :, :], sp_im_p[:, :, psp:psp + h_out, :, :]
    ar_w, ai_w = sp_re_p[:, :, :, psp:psp + w_out, :], sp_im_p[:, :, :, psp:psp + w_out, :]
    xt_re = conv(ar_h, kxt_re) - conv(ai_h, kxt_im)
    xt_im = conv(ar_h, kxt_im) + conv(ai_h, kxt_re)
    yt_re = conv(ar_w, kyt_re) - conv(ai_w, kyt_im)
    yt_im = conv(ar_w, kyt_im) + conv(ai_w, kyt_re)
    zr, zi = xt_re + yt_re, xt_im + yt_im
    a = mod.alpha.reshape(1, 1, 1, 1, -1)
    zr = jnp.where(zr >= 0, zr, a * zr)
    zi = jnp.where(zi >= 0, zi, a * zi)
    out = (zr + 1j * zi).astype(jnp.complex64)
    return jnp.transpose(out, (0, 4, 1, 2, 3))


# ----------------------------------- main ------------------------------------

if __name__ == "__main__":
    key = jax.random.PRNGKey(0)
    k_x, k_mod = jax.random.split(key)

    B, Cin, Cout, T, H, W = 2, 4, 2, 4, 8, 8
    stride = 2
    mod = ComplexSplitFastUpsamplingPallas(
        in_channels=Cin, inter_channels=0, out_channels=Cout,
        kernel_size_sp=3, kernel_size_t=3, stride=stride, key=k_mod)

    ri = jax.random.normal(k_x, (2, B, Cin, T, H, W), jnp.float32)
    x = (ri[0] + 1j * ri[1]).astype(jnp.complex64)

    H_out, W_out = H * stride, W * stride
    output_shape = (B, mod.inter_channels, T, H_out, W_out)

    out = jax.block_until_ready(mod(x, output_shape))

    assert out.shape == (B, Cout, T, H_out, W_out)
    assert out.dtype == jnp.complex64

    ref = forward_reference(mod, x, output_shape)
    np.testing.assert_allclose(np.asarray(out), np.asarray(ref), rtol=1e-2, atol=1e-2)

    print("KERNEL_OK")
</pallas_src>

<mosaic_0001>
module attributes {stable_mosaic.version = 11 : i64} {
  func.func @_stage1_kernel(%arg0: i32, %arg1: i32, %arg2: memref<1x1x8x422xbf16, #tpu.memory_space<vmem>>, %arg3: memref<9x8x8xbf16, #tpu.memory_space<vmem>>, %arg4: memref<1x1x8x384xbf16, #tpu.memory_space<vmem>>) attributes {dimension_semantics = [#tpu.dimension_semantics<parallel>, #tpu.dimension_semantics<parallel>], iteration_bounds = array<i64: 2, 4>, scalar_prefetch = 0 : i64, scratch_operands = 0 : i64, tpu.core_type = #tpu.core_type<tc>, window_params = [{transform_indices = @transform_0, window_bounds = array<i64: 1, 1, 8, 422>}, {pipeline_mode = #tpu.pipeline_mode<synchronous>, transform_indices = @transform_1, window_bounds = array<i64: 9, 8, 8>}, {transform_indices = @transform_2, window_bounds = array<i64: 1, 1, 8, 384>}]} {
    %cst = arith.constant 0.000000e+00 : f32
    %0 = vector.broadcast %cst : f32 to vector<8x384xf32>
    %c0 = arith.constant 0 : index
    %c0_0 = arith.constant 0 : index
    %c0_1 = arith.constant 0 : index
    %1 = vector.load %arg3[%c0, %c0_0, %c0_1] : memref<9x8x8xbf16, #tpu.memory_space<vmem>>, vector<1x8x8xbf16>
    %2 = vector.shape_cast %1 : vector<1x8x8xbf16> to vector<8x8xbf16>
    %c0_2 = arith.constant 0 : index
    %c0_3 = arith.constant 0 : index
    %c0_4 = arith.constant 0 : index
    %c0_5 = arith.constant 0 : index
    %3 = vector.load %arg2[%c0_2, %c0_3, %c0_4, %c0_5] : memref<1x1x8x422xbf16, #tpu.memory_space<vmem>>, vector<1x1x8x384xbf16>
    %4 = vector.shape_cast %3 : vector<1x1x8x384xbf16> to vector<8x384xbf16>
    %cst_6 = arith.constant dense<0.000000e+00> : vector<8x384xf32>
    %5 = tpu.matmul %2, %4, %cst_6 {dimension_numbers = #tpu.dot_dimension_numbers<[1], [0], [0], [1], [0, 0, 1, 1], [], []>} : vector<8x8xbf16>, vector<8x384xbf16>, vector<8x384xf32> -> vector<8x384xf32>
    %6 = arith.addf %0, %5 : vector<8x384xf32>
    %c1 = arith.constant 1 : index
    %c0_7 = arith.constant 0 : index
    %c0_8 = arith.constant 0 : index
    %7 = vector.load %arg3[%c1, %c0_7, %c0_8] : memref<9x8x8xbf16, #tpu.memory_space<vmem>>, vector<1x8x8xbf16>
    %8 = vector.shape_cast %7 : vector<1x8x8xbf16> to vector<8x8xbf16>
    %c0_9 = arith.constant 0 : index
    %c0_10 = arith.constant 0 : index
    %c0_11 = arith.constant 0 : index
    %c1_12 = arith.constant 1 : index
    %9 = vector.load %arg2[%c0_9, %c0_10, %c0_11, %c1_12] : memref<1x1x8x422xbf16, #tpu.memory_space<vmem>>, vector<1x1x8x384xbf16>
    %10 = vector.shape_cast %9 : vector<1x1x8x384xbf16> to vector<8x384xbf16>
    %cst_13 = arith.constant dense<0.000000e+00> : vector<8x384xf32>
    %11 = tpu.matmul %8, %10, %cst_13 {dimension_numbers = #tpu.dot_dimension_numbers<[1], [0], [0], [1], [0, 0, 1, 1], [], []>} : vector<8x8xbf16>, vector<8x384xbf16>, vector<8x384xf32> -> vector<8x384xf32>
    %12 = arith.addf %6, %11 : vector<8x384xf32>
    %c2 = arith.constant 2 : index
    %c0_14 = arith.constant 0 : index
    %c0_15 = arith.constant 0 : index
    %13 = vector.load %arg3[%c2, %c0_14, %c0_15] : memref<9x8x8xbf16, #tpu.memory_space<vmem>>, vector<1x8x8xbf16>
    %14 = vector.shape_cast %13 : vector<1x8x8xbf16> to vector<8x8xbf16>
    %c0_16 = arith.constant 0 : index
    %c0_17 = arith.constant 0 : index
    %c0_18 = arith.constant 0 : index
    %c2_19 = arith.constant 2 : index
    %15 = vector.load %arg2[%c0_16, %c0_17, %c0_18, %c2_19] : memref<1x1x8x422xbf16, #tpu.memory_space<vmem>>, vector<1x1x8x384xbf16>
    %16 = vector.shape_cast %15 : vector<1x1x8x384xbf16> to vector<8x384xbf16>
    %cst_20 = arith.constant dense<0.000000e+00> : vector<8x384xf32>
    %17 = tpu.matmul %14, %16, %cst_20 {dimension_numbers = #tpu.dot_dimension_numbers<[1], [0], [0], [1], [0, 0, 1, 1], [], []>} : vector<8x8xbf16>, vector<8x384xbf16>, vector<8x384xf32> -> vector<8x384xf32>
    %18 = arith.addf %12, %17 : vector<8x384xf32>
    %c3 = arith.constant 3 : index
    %c0_21 = arith.constant 0 : index
    %c0_22 = arith.constant 0 : index
    %19 = vector.load %arg3[%c3, %c0_21, %c0_22] : memref<9x8x8xbf16, #tpu.memory_space<vmem>>, vector<1x8x8xbf16>
    %20 = vector.shape_cast %19 : vector<1x8x8xbf16> to vector<8x8xbf16>
    %c0_23 = arith.constant 0 : index
    %c0_24 = arith.constant 0 : index
    %c0_25 = arith.constant 0 : index
    %c18 = arith.constant 18 : index
    %21 = vector.load %arg2[%c0_23, %c0_24, %c0_25, %c18] : memref<1x1x8x422xbf16, #tpu.memory_space<vmem>>, vector<1x1x8x384xbf16>
    %22 = vector.shape_cast %21 : vector<1x1x8x384xbf16> to vector<8x384xbf16>
    %cst_26 = arith.constant dense<0.000000e+00> : vector<8x384xf32>
    %23 = tpu.matmul %20, %22, %cst_26 {dimension_numbers = #tpu.dot_dimension_numbers<[1], [0], [0], [1], [0, 0, 1, 1], [], []>} : vector<8x8xbf16>, vector<8x384xbf16>, vector<8x384xf32> -> vector<8x384xf32>
    %24 = arith.addf %18, %23 : vector<8x384xf32>
    %c4 = arith.constant 4 : index
    %c0_27 = arith.constant 0 : index
    %c0_28 = arith.constant 0 : index
    %25 = vector.load %arg3[%c4, %c0_27, %c0_28] : memref<9x8x8xbf16, #tpu.memory_space<vmem>>, vector<1x8x8xbf16>
    %26 = vector.shape_cast %25 : vector<1x8x8xbf16> to vector<8x8xbf16>
    %c0_29 = arith.constant 0 : index
    %c0_30 = arith.constant 0 : index
    %c0_31 = arith.constant 0 : index
    %c19 = arith.constant 19 : index
    %27 = vector.load %arg2[%c0_29, %c0_30, %c0_31, %c19] : memref<1x1x8x422xbf16, #tpu.memory_space<vmem>>, vector<1x1x8x384xbf16>
    %28 = vector.shape_cast %27 : vector<1x1x8x384xbf16> to vector<8x384xbf16>
    %cst_32 = arith.constant dense<0.000000e+00> : vector<8x384xf32>
    %29 = tpu.matmul %26, %28, %cst_32 {dimension_numbers = #tpu.dot_dimension_numbers<[1], [0], [0], [1], [0, 0, 1, 1], [], []>} : vector<8x8xbf16>, vector<8x384xbf16>, vector<8x384xf32> -> vector<8x384xf32>
    %30 = arith.addf %24, %29 : vector<8x384xf32>
    %c5 = arith.constant 5 : index
    %c0_33 = arith.constant 0 : index
    %c0_34 = arith.constant 0 : index
    %31 = vector.load %arg3[%c5, %c0_33, %c0_34] : memref<9x8x8xbf16, #tpu.memory_space<vmem>>, vector<1x8x8xbf16>
    %32 = vector.shape_cast %31 : vector<1x8x8xbf16> to vector<8x8xbf16>
    %c0_35 = arith.constant 0 : index
    %c0_36 = arith.constant 0 : index
    %c0_37 = arith.constant 0 : index
    %c20 = arith.constant 20 : index
    %33 = vector.load %arg2[%c0_35, %c0_36, %c0_37, %c20] : memref<1x1x8x422xbf16, #tpu.memory_space<vmem>>, vector<1x1x8x384xbf16>
    %34 = vector.shape_cast %33 : vector<1x1x8x384xbf16> to vector<8x384xbf16>
    %cst_38 = arith.constant dense<0.000000e+00> : vector<8x384xf32>
    %35 = tpu.matmul %32, %34, %cst_38 {dimension_numbers = #tpu.dot_dimension_numbers<[1], [0], [0], [1], [0, 0, 1, 1], [], []>} : vector<8x8xbf16>, vector<8x384xbf16>, vector<8x384xf32> -> vector<8x384xf32>
    %36 = arith.addf %30, %35 : vector<8x384xf32>
    %c6 = arith.constant 6 : index
    %c0_39 = arith.constant 0 : index
    %c0_40 = arith.constant 0 : index
    %37 = vector.load %arg3[%c6, %c0_39, %c0_40] : memref<9x8x8xbf16, #tpu.memory_space<vmem>>, vector<1x8x8xbf16>
    %38 = vector.shape_cast %37 : vector<1x8x8xbf16> to vector<8x8xbf16>
    %c0_41 = arith.constant 0 : index
    %c0_42 = arith.constant 0 : index
    %c0_43 = arith.constant 0 : index
    %c36 = arith.constant 36 : index
    %39 = vector.load %arg2[%c0_41, %c0_42, %c0_43, %c36] : memref<1x1x8x422xbf16, #tpu.memory_space<vmem>>, vector<1x1x8x384xbf16>
    %40 = vector.shape_cast %39 : vector<1x1x8x384xbf16> to vector<8x384xbf16>
    %cst_44 = arith.constant dense<0.000000e+00> : vector<8x384xf32>
    %41 = tpu.matmul %38, %40, %cst_44 {dimension_numbers = #tpu.dot_dimension_numbers<[1], [0], [0], [1], [0, 0, 1, 1], [], []>} : vector<8x8xbf16>, vector<8x384xbf16>, vector<8x384xf32> -> vector<8x384xf32>
    %42 = arith.addf %36, %41 : vector<8x384xf32>
    %c7 = arith.constant 7 : index
    %c0_45 = arith.constant 0 : index
    %c0_46 = arith.constant 0 : index
    %43 = vector.load %arg3[%c7, %c0_45, %c0_46] : memref<9x8x8xbf16, #tpu.memory_space<vmem>>, vector<1x8x8xbf16>
    %44 = vector.shape_cast %43 : vector<1x8x8xbf16> to vector<8x8xbf16>
    %c0_47 = arith.constant 0 : index
    %c0_48 = arith.constant 0 : index
    %c0_49 = arith.constant 0 : index
    %c37 = arith.constant 37 : index
    %45 = vector.load %arg2[%c0_47, %c0_48, %c0_49, %c37] : memref<1x1x8x422xbf16, #tpu.memory_space<vmem>>, vector<1x1x8x384xbf16>
    %46 = vector.shape_cast %45 : vector<1x1x8x384xbf16> to vector<8x384xbf16>
    %cst_50 = arith.constant dense<0.000000e+00> : vector<8x384xf32>
    %47 = tpu.matmul %44, %46, %cst_50 {dimension_numbers = #tpu.dot_dimension_numbers<[1], [0], [0], [1], [0, 0, 1, 1], [], []>} : vector<8x8xbf16>, vector<8x384xbf16>, vector<8x384xf32> -> vector<8x384xf32>
    %48 = arith.addf %42, %47 : vector<8x384xf32>
    %c8 = arith.constant 8 : index
    %c0_51 = arith.constant 0 : index
    %c0_52 = arith.constant 0 : index
    %49 = vector.load %arg3[%c8, %c0_51, %c0_52] : memref<9x8x8xbf16, #tpu.memory_space<vmem>>, vector<1x8x8xbf16>
    %50 = vector.shape_cast %49 : vector<1x8x8xbf16> to vector<8x8xbf16>
    %c0_53 = arith.constant 0 : index
    %c0_54 = arith.constant 0 : index
    %c0_55 = arith.constant 0 : index
    %c38 = arith.constant 38 : index
    %51 = vector.load %arg2[%c0_53, %c0_54, %c0_55, %c38] : memref<1x1x8x422xbf16, #tpu.memory_space<vmem>>, vector<1x1x8x384xbf16>
    %52 = vector.shape_cast %51 : vector<1x1x8x384xbf16> to vector<8x384xbf16>
    %cst_56 = arith.constant dense<0.000000e+00> : vector<8x384xf32>
    %53 = tpu.matmul %50, %52, %cst_56 {dimension_numbers = #tpu.dot_dimension_numbers<[1], [0], [0], [1], [0, 0, 1, 1], [], []>} : vector<8x8xbf16>, vector<8x384xbf16>, vector<8x384xf32> -> vector<8x384xf32>
    %54 = arith.addf %48, %53 : vector<8x384xf32>
    %55 = arith.truncf %54 : vector<8x384xf32> to vector<8x384xbf16>
    %c0_57 = arith.constant 0 : index
    %c0_58 = arith.constant 0 : index
    %c0_59 = arith.constant 0 : index
    %c0_60 = arith.constant 0 : index
    %56 = vector.load %arg4[%c0_57, %c0_58, %c0_59, %c0_60] : memref<1x1x8x384xbf16, #tpu.memory_space<vmem>>, vector<1x1x8x384xbf16>
    %57 = vector.shape_cast %56 : vector<1x1x8x384xbf16> to vector<8x384xbf16>
    %58 = vector.shape_cast %55 : vector<8x384xbf16> to vector<1x1x8x384xbf16>
    tpu.vector_store %arg4[%c0_57, %c0_58, %c0_59, %c0_60], %58 {strides = array<i32>} : memref<1x1x8x384xbf16, #tpu.memory_space<vmem>>, vector<1x1x8x384xbf16>,
    return
  }
  func.func @transform_0(%arg0: i32, %arg1: i32) -> (i32, i32, i32, i32) {
    %c0_i32 = arith.constant 0 : i32
    %c0_i32_0 = arith.constant 0 : i32
    %c0_i32_1 = arith.constant 0 : i32
    return %arg0, %arg1, %c0_i32, %c0_i32_0 : i32, i32, i32, i32
  }
  func.func @transform_1(%arg0: i32, %arg1: i32) -> (i32, i32, i32) {
    %c0_i32 = arith.constant 0 : i32
    %c0_i32_0 = arith.constant 0 : i32
    %c0_i32_1 = arith.constant 0 : i32
    %c0_i32_2 = arith.constant 0 : i32
    return %c0_i32, %c0_i32_0, %c0_i32_1 : i32, i32, i32
  }
  func.func @transform_2(%arg0: i32, %arg1: i32) -> (i32, i32, i32, i32) {
    %c0_i32 = arith.constant 0 : i32
    %c0_i32_0 = arith.constant 0 : i32
    %c0_i32_1 = arith.constant 0 : i32
    return %arg0, %arg1, %c0_i32, %c0_i32_0 : i32, i32, i32, i32
  }
}

</mosaic_0001>

<bundles_post_ra>
// kernel: tpu_custom_call.1
= control target key start
LH: loop header
LB: loop body
LE: loop exit
PB: predicated region body
PF: predicated region fallthrough
CT: control target
= control target key end

     0   :  { %7 = vsyncpa [#allocation3], 0  ;;  %s2061_s0 = inlined_call_operand.hbm [shape: bf16[2,4,8,422], index: 0, kind: input, shape index: {}]   ;;  %s2062_s1 = inlined_call_operand.vmem [shape: bf16[9,8,8], index: 1, kind: input, shape index: {}]   ;;  %s2063_s2 = inlined_call_operand.hbm [shape: bf16[2,4,8,384], index: 2, kind: output, shape index: {}]  }
   0x1   :  { %9 = vsyncpa [#allocation3 + $0x1], 0 }
   0x2   :  { %10 = vsyncpa [#allocation4], 0 }
   0x3   :  { %12 = vsyncpa [#allocation4 + $0x1], 0  ;;  %s1735_s9 = smov 0   ;;  %s1737_s10 = smov 0  }
   0x4   :  { %s1739_s11 = smov 0   ;;  %s1741_s12 = smov 0  }
   0x5   :  { %s1743_s13 = smov 0   ;;  %s1745_s14 = smov 0  }
   0x6   :  { %s1747_s15 = smov 0   ;;  %s1749_s16 = smov 0  }
   0x7 LB: > { %s1287_s17 = sadd.s32 4294967295, %s1705_s16   ;;  %s1288_s18 = sadd.s32 4294967294, %s1705_s16   ;;  %s1705_s16 = sphi %s1749_s16, %s18_s16   ;;  %s1701_s15 = sphi %s1747_s15, %s2080_s15   ;;  %s1697_s14 = sphi %s1745_s14, %s2079_s14   ;;  %s1693_s13 = sphi %s1743_s13, %s2078_s13   ;;  %s1689_s12 = sphi %s1741_s12, %s2077_s12   ;;  %s1685_s11 = sphi %s1739_s11, %s2076_s11   ;;  %s1681_s10 = sphi %s1737_s10, %s2075_s10   ;;  %s1677_s9 = sphi %s1735_s9, %s2074_s9  }
   0x8   : > { %s27_s19 = sadd.s32 1, %s1697_s14  ;;  %s30_s20 = sadd.s32 1, %s1701_s15 }
   0x9   : > { %p28_p0 = scmp.ge.s32.totalorder %s27_s19, 4  ;;  %s39_s21 = sadd.s32 1, %s1685_s11 }
   0xa   : > { %p46_p1 = scmp.ne.s32.totalorder %s1685_s11, %s1681_s10  ;;  %p47_p2 = scmp.eq.s32.totalorder %s1705_s16, 0 }
   0xb   : > { %s2082_s19 = smov (%p28_p0, %s27_s19), 0  ;;  %s2084_s20 = smov (!%p28_p0, %s30_s20), %s1701_s15 }
   0xc   : > { %s35_s22 = ssub.s32 %s1697_s14, %s2082_s19  ;;  %p1788_p3 = por %p47_p2, %p46_p1 }
   0xd   : > { %p32_p4 = scmp.ge.s32.totalorder %s2084_s20, 2  ;;  %p52_p5 = scmp.ne.s32.totalorder %s1681_s10, %s1677_s9 }
   0xe   : > { %p53_p6 = scmp.eq.s32.totalorder %s1287_s17, 0  ;;  %p99_p7 = scmp.eq.s32.totalorder %s1287_s17, 7 }
   0xf   : > { %s2086_s20 = smov (%p32_p4, %s2084_s20), 0  ;;  %p105_p10 = scmp.eq.s32.totalorder %s1288_s18, 7 }
  0x10   : > { %p1796_p8 = por %p53_p6, %p52_p5  ;;  %p1800_p9 = por %p99_p7, %p46_p1 }
  0x11   : > { %s34_s26 = ssub.s32 %s1701_s15, %s2086_s20  ;;  %p1806_p12 = por %p105_p10, %p52_p5 }
  0x12   : > { %s2067_s25 = scalar_select %p1800_p9, 1, 0 }
  0x13   : > { %s36_s27 = sor.u32 %s35_s22, %s34_s26  ;;  %p1495_p13 = scmp.lt.s32.totalorder %s1705_s16, 8 }
  0x14   : > { %p37_p11 = scmp.eq.s32.totalorder %s36_s27, 0  ;;  %s128_s29 = sand.u32 1, %s1685_s11  }
  0x15   : > { %s2068_s28 = scalar_select %p1806_p12, 1, 0 }
  0x16   : > { %s1813_s30 = scalar_select %p37_p11, %s1685_s11, %s39_s21  }
  0x17   : > { %s1291_s3 = sshll.u32 %s128_s29, 4  ;;  %s1292_s4 = sshll.u32 %s1697_s14, 2 }
  0x18   : > { %s1293_s5 = sshll.u32 %s1701_s15, 4  ;;  %s132_s6 = scalar_lea.vmem [#allocation2], %s1291_s3 }
  0x19   : > { %s142_s7 = sshll.u32 %s132_s6, 4  ;;  %s138_s8 = sadd.s32 %s1293_s5, %s1292_s4  ;;  %s1817_s7 = int_to_ptr.vmem [resolvable:$true] %s142_s7 }
  0x1a   : > { %s1294_s17 = sshll.u32 %s138_s8, 6  ;;  %p1821_p0 = pnand %p1495_p13, %p1788_p3 }
  0x1b   : > { %s1828_s21 = scalar_lea.hbm %s2061_s0, %s1294_s17  ;;  %s129_s27 = scalar_lea.sflag [#allocation3], %s128_s29 }
  0x1c   : > { %s1577_s3 = scalar_lea.hbm %s1828_s21, 256  ;;  %p1579_p3 = pneg %p1821_p0 }
  0x1d   : > { %p1578_p4 = scmp.ne.s32.totalorder %s1828_s21, %s1577_s3  ;;  %s1582_s5 = scalar_lea.hbm %s2061_s0, 2048 }
  0x1e   : > { %p1583_p7 = scmp.lt.u32.totalorder %s1828_s21, %s2061_s0  ;;  %p1584_p10 = scmp.lt.u32.totalorder %s1582_s5, %s1577_s3 }
  0x1f   : > { %p1580_p5 = pnand %p1579_p3, %p1578_p4  ;;  %p1586_p13 = scmp.lt.u32.totalorder %s1577_s3, %s1828_s21 }
  0x20   : > { %p1585_p11 = por %p1584_p10, %p1583_p7 }
  0x21   : > { %p1581_p6 = pneg %p1580_p5 }
  0x22   : > { %p1587_p1 = por %p1586_p13, %p1585_p11 }
  0x24   : > { %p1588_p2 = pnand %p1587_p1, %p1581_p6 }
  0x26   : > { %1591 = shalt.err (!%p1588_p2)
}
  0x27   : > { %s1592_s29 = scalar_lea.vmem %s1817_s7, 256  ;;  %s1707_s17 = smov [#allocation2]  }
  0x28   : > { %p1593_p4 = scmp.ne.s32.totalorder %s1817_s7, %s1592_s29  ;;  %s1597_s22 = sshll.u32 %s1707_s17, 4  ;;  %s1598_s22 = int_to_ptr.vmem [resolvable:$false] %s1597_s22 }
  0x29   : > { %s1599_s26 = scalar_lea.vmem %s1598_s22, 512  ;;  %p1600_p9 = scmp.lt.s32.totalorder %s1817_s7, %s1598_s22 }
  0x2a   : > { %p1595_p5 = pnand %p1593_p4, %p1579_p3  ;;  %p1601_p7 = scmp.lt.s32.totalorder %s1599_s26, %s1592_s29 }
  0x2c   : > { %p1596_p12 = pneg %p1595_p5  ;;  %p1602_p10 = por %p1601_p7, %p1600_p9 }
  0x2e   : > { %p1603_p11 = pnand %p1602_p10, %p1596_p12 }
  0x30   : > { %1606 = shalt.err (!%p1603_p11)
}
  0x31   : > { %1490 = dma.hbm_to_vmem [thread:$0]  (!%p1821_p0), %s1828_s21, 256, %s1817_s7, %s129_s27  }
  0x32   : > { %p2070_p1 = scmp.lt.s32.totalorder %s1705_s16, 9  ;;  %p2071_p2 = scmp.ge.s32.totalorder %s1705_s16, 1 }
  0x34   : > { %p148_p3 = pnand %p2071_p2, %p2070_p1 }
  0x35   : > { %s1862_s3 = sand.u32 (!%p148_p3), 1, %s1681_s10  }
  0x36   : > { %151 = sbr.rel (%p148_p3) target bundleno = 514 (0x202), region = 28  ;;  %s1296_s23 = sshll.u32 (!%p148_p3), %s1862_s3, 4 }
  0x37   : > { %s154_s4 = scalar_lea.sflag (!%p148_p3), [#allocation3], %s1862_s3  ;;  %s1866_s5 = scalar_lea.vmem (!%p148_p3), [#allocation2], %s1296_s23 }
  0x3d   : > { %1668 = dma.done.wait (%p1796_p8), %s154_s4, 256  }
  0x3e   : > { %1670 = vsyncadd (%p1796_p8), %s154_s4, 4294967040  ;;  %v1708_v0 = vmov 0.0   ;;  %v1709_v1 = vmov 0   ;;  %vm1710_vm0 = vmmov 0   ;;  %v184_v2 = vld [vmem:[%s1866_s5 + $0x8] sm:$0xff]  ;;  %v180_v3 = vld [vmem:[%s1866_s5] sm:$0xff] }
  0x3f   : > { %1362 = vmatprep.subr.bf16.mxu1 %v1708_v0  ;;  %253 = vmatprep.mubr.bf16.mxu0 %v1709_v1  ;;  %v1300_v4 = vcombine.low %v184_v2, %v184_v2  ;;  %v1298_v5 = vcombine.low %v180_v3, %v180_v3  ;;  %s1711_s7 = smov 127   ;;  %v1301_v6 = vcombine.high %v184_v2, %v184_v2  ;;  %s1712_s24 = smov 126   ;;  %vm203_vm1 = vcmask 1039360   ;;  %v1576_v12 = vld [vmem:[%s1866_s5 + $0x8] ss:$0 sps:$4 sm:$0xff]  }
  0x40   : > { %1364 = vmatprep.mubr.msk.bf16.mxu1 %vm1710_vm0, %v1708_v0  ;;  %v1299_v7 = vcombine.high %v180_v3, %v180_v3  ;;  %s1713_s18 = smov 110   ;;  %s1714_s21 = smov 109   ;;  %vm211_vm2 = vcmask 1043456   ;;  %v1297_v18 = vld [vmem:[%s2062_s1 + $0x4] sm:$0xf]  ;;  %vm207_vm3 = vcmask 64512  }
  0x41   : > { %199 = vrot.lane.b32.xlu1 %v1300_v4, %s1711_s7  ;;  %195 = vrot.lane.b32.xlu0 %v1298_v5, %s1711_s7  ;;  %s1715_s27 = smov 108   ;;  %s1716_s6 = smov 92   ;;  %v309_v19 = vsel %vm211_vm2, %v1298_v5, 0  ;;  %v315_v20 = vsel %vm211_vm2, %v1576_v12, 0  ;;  %vm408_vm4 = vcmask 1031168   ;;  %vm518_vm5 = vcmask 900096  }
  0x42   : > { %s1717_s8 = smov 91   ;;  %s1718_s29 = smov 90   ;;  %v179_v30 = vld [vmem:[%s2062_s1] sm:$0xf]  ;;  %vm628_vm6 = vcmask 891904   ;;  %vm738_vm7 = vcmask 883712  }
  0x43   : > { %v1309_v41 = vld [vmem:[%s2062_s1 + $0x8] sm:$0xf]  ;;  %v1313_v51 = vld [vmem:[%s2062_s1 + $0xc] sm:$0xf]  ;;  %vm848_vm8 = vcmask 752640   ;;  %vm958_vm9 = vcmask 744448  }
  0x44   : > { %v1317_v61 = vld [vmem:[%s2062_s1 + $0x10] sm:$0xf]  ;;  %vm1068_vm10 = vcmask 736256   ;;  %s1480_s4 = smul.u32 12, %s1862_s3  ;;  %p2072_p9 = scmp.ne.s32.totalorder %s2067_s25, 0 }
  0x45   : > { %201 = vrot.lane.b32.xlu1 %v1301_v6, %s1711_s7  ;;  %197 = vrot.lane.b32.xlu0 %v1299_v7, %s1711_s7  ;;  %s1481_s5 = smul.u32 3, %s1689_s12  ;;  %s1184_s12 = scalar_lea.sflag [#allocation4], %s1862_s3 }
  0x46   : > { %s1482_s7 = smul.u32 12, %s1693_s13  ;;  %s1719_s17 = smov [#allocation5]  }
  0x47   : > { %s1611_s22 = sshll.u32 %s1719_s17, 4  ;;  %s1612_s22 = int_to_ptr.vmem [resolvable:$false] %s1611_s22 }
  0x48   : > { %s1613_s26 = scalar_lea.vmem %s1612_s22, 384 }
  0x49   : > { %400 = vrot.lane.b32.xlu0 %v1298_v5, %s1712_s24  ;;  %402 = vrot.lane.b32.xlu1 %v1299_v7, %s1712_s24 }
  0x4d   : > { %404 = vrot.lane.b32.xlu0 %v1300_v4, %s1712_s24  ;;  %406 = vrot.lane.b32.xlu1 %v1301_v6, %s1712_s24  ;;  %s1196_s24 = sadd.s32 %s1482_s7, %s1481_s5 }
  0x51   : > { %510 = vrot.lane.b32.xlu0 %v1298_v5, %s1713_s18  ;;  %512 = vrot.lane.b32.xlu1 %v1299_v7, %s1713_s18 }
  0x55   : > { %514 = vrot.lane.b32.xlu0 %v1300_v4, %s1713_s18  ;;  %516 = vrot.lane.b32.xlu1 %v1301_v6, %s1713_s18  ;;  %s1339_s18 = sshll.u32 %s1196_s24, 6 }
  0x59   : > { %620 = vrot.lane.b32.xlu0 %v1298_v5, %s1714_s21  ;;  %622 = vrot.lane.b32.xlu1 %v1299_v7, %s1714_s21 }
  0x5d   : > { %624 = vrot.lane.b32.xlu0 %v1300_v4, %s1714_s21  ;;  %626 = vrot.lane.b32.xlu1 %v1301_v6, %s1714_s21  ;;  %s177_s21 = scalar_lea.vmem [#allocation5], %s1480_s4 }
  0x61   : > { %730 = vrot.lane.b32.xlu0 %v1298_v5, %s1715_s27  ;;  %732 = vrot.lane.b32.xlu1 %v1299_v7, %s1715_s27 }
  0x65   : > { %734 = vrot.lane.b32.xlu0 %v1300_v4, %s1715_s27  ;;  %736 = vrot.lane.b32.xlu1 %v1301_v6, %s1715_s27  ;;  %s1200_s27 = sshll.u32 %s177_s21, 4  ;;  %s2009_s27 = int_to_ptr.vmem [resolvable:$true] %s1200_s27 }
  0x66   : > { %s1607_s13 = scalar_lea.vmem %s2009_s27, 192  ;;  %p1614_p6 = scmp.lt.s32.totalorder %s2009_s27, %s1612_s22 }
  0x67   : > { %p1608_p8 = scmp.ne.s32.totalorder %s2009_s27, %s1607_s13  ;;  %p1615_p13 = scmp.lt.s32.totalorder %s1613_s26, %s1607_s13 }
  0x69   : > { %840 = vrot.lane.b32.xlu0 %v1298_v5, %s1716_s6  ;;  %842 = vrot.lane.b32.xlu1 %v1299_v7, %s1716_s6  ;;  %p1609_p12 = pnand %p1608_p8, %p2072_p9  ;;  %p1616_p4 = por %p1615_p13, %p1614_p6 }
  0x6b   : > { %p1610_p0 = pneg %p1609_p12 }
  0x6d   : > { %844 = vrot.lane.b32.xlu0 %v1300_v4, %s1716_s6  ;;  %846 = vrot.lane.b32.xlu1 %v1301_v6, %s1716_s6  ;;  %p1617_p5 = pnand %p1616_p4, %p1610_p0 }
  0x71   : > { %950 = vrot.lane.b32.xlu0 %v1298_v5, %s1717_s8  ;;  %952 = vrot.lane.b32.xlu1 %v1299_v7, %s1717_s8 }
  0x75   : > { %954 = vrot.lane.b32.xlu0 %v1300_v4, %s1717_s8  ;;  %956 = vrot.lane.b32.xlu1 %v1301_v6, %s1717_s8 }
  0x79   : > { %1060 = vrot.lane.b32.xlu0 %v1298_v5, %s1718_s29  ;;  %1062 = vrot.lane.b32.xlu1 %v1299_v7, %s1718_s29 }
  0x7d   : > { %1064 = vrot.lane.b32.xlu0 %v1300_v4, %s1718_s29  ;;  %1066 = vrot.lane.b32.xlu1 %v1301_v6, %s1718_s29  ;;  %s2007_s29 = scalar_lea.hbm %s2063_s2, %s1339_s18 }
  0xb3   : > { %v200_v8 = vpop.permute.xlu1 %199  ;;  %v196_v9 = vpop.permute.xlu0 %195 }
  0xb7   : > { %v202_v10 = vpop.permute.xlu1 %201  ;;  %v198_v11 = vpop.permute.xlu0 %197 }
  0xb8   : > { %v205_v13 = vsel %vm203_vm1, %v198_v11, %v200_v8  ;;  %v204_v14 = vsel %vm203_vm1, %v196_v9, %v198_v11  ;;  %v206_v15 = vsel %vm203_vm1, %v200_v8, %v202_v10  ;;  %v1321_v9 = vld [vmem:[%s2062_s1 + $0x14] sm:$0xf] }
  0xb9   : > { %1302 = vmatprep.subr.msk.bf16.mxu0 %vm211_vm2, %v205_v13  ;;  %v213_v16 = vsel %vm211_vm2, %v204_v14, 0  ;;  %v219_v17 = vsel %vm211_vm2, %v206_v15, 0 }
  0xba   : > { %222 = vmatpush1.bf16.msra.mxu0 %v213_v16  ;;  %1363 = vmatpush3.bf16.msra.mxu1 %v219_v17 }
  0xbb   : > { %1306 = vmatprep.subr.msk.bf16.mxu0 %vm211_vm2, %v1299_v7  ;;  %1368 = vmatprep.subr.bf16.mxu1 %v1708_v0  ;;  %v401_v21 = vpop.permute.xlu0 %400  ;;  %v403_v22 = vpop.permute.xlu1 %402 }
  0xbc   : > { %v409_v27 = vsel %vm408_vm4, %v401_v21, %v403_v22 }
  0xbd   : > { %1303 = vmatmul.mubr.msk.bf16.vlgmr.msra.gmra.mrb[0].mxu0 %vm207_vm3, %v1297_v18  ;;  %1365 = vmatmul.mubr.msk.bf16.vlgmr.msra.gmra.mrb[0].mxu1 %vm207_vm3, %v1297_v18  ;;  %v416_v31 = vsel %vm211_vm2, %v409_v27, 0 }
  0xbe   : > { %318 = vmatpush1.bf16.msra.mxu0 %v309_v19  ;;  %1369 = vmatpush3.bf16.msra.mxu1 %v315_v20  ;;  %v1325_v19 = vld [vmem:[%s2062_s1 + $0x18] sm:$0xf] }
  0xbf   : > { %v405_v23 = vpop.permute.xlu0 %404  ;;  %349 = vmatprep.mubr.bf16.mxu0 %v1709_v1  ;;  %1370 = vmatprep.mubr.msk.bf16.mxu1 %vm1710_vm0, %v1708_v0  ;;  %v407_v25 = vpop.permute.xlu1 %406 }
  0xc0   : > { %v410_v24 = vsel %vm408_vm4, %v403_v22, %v405_v23  ;;  %1374 = vmatprep.subr.bf16.mxu1 %v1708_v0  ;;  %v411_v28 = vsel %vm408_vm4, %v405_v23, %v407_v25 }
  0xc1   : > { %1310 = vmatprep.subr.msk.bf16.mxu0 %vm211_vm2, %v410_v24  ;;  %v422_v32 = vsel %vm211_vm2, %v411_v28, 0 }
  0xc3   : > { %v511_v26 = vpop.permute.xlu0 %510  ;;  %v513_v29 = vpop.permute.xlu1 %512 }
  0xc4   : > { %v519_v37 = vsel %vm518_vm5, %v511_v26, %v513_v29  ;;  %v1329_v26 = vld [vmem:[%s2062_s1 + $0x1c] sm:$0xf] }
  0xc5   : > { %v526_v42 = vsel %vm211_vm2, %v519_v37, 0 }
  0xc7   : > { %v515_v33 = vpop.permute.xlu0 %514  ;;  %v517_v36 = vpop.permute.xlu1 %516 }
  0xc8   : > { %v520_v34 = vsel %vm518_vm5, %v513_v29, %v515_v33  ;;  %v521_v38 = vsel %vm518_vm5, %v515_v33, %v517_v36  ;;  %v1333_v29 = vld [vmem:[%s2062_s1 + $0x20] sm:$0xf] }
  0xc9   : > { %1307 = vmatmul.mubr.msk.bf16.vlgmr.msra.gmra.mrb[0].mxu0 %vm207_vm3, %v179_v30  ;;  %1371 = vmatmul.mubr.msk.bf16.vlgmr.msra.gmra.mrb[0].mxu1 %vm207_vm3, %v179_v30  ;;  %v532_v43 = vsel %vm211_vm2, %v521_v38, 0 }
  0xca   : > { %425 = vmatpush1.bf16.msra.mxu0 %v416_v31  ;;  %1375 = vmatpush3.bf16.msra.mxu1 %v422_v32 }
  0xcb   : > { %1314 = vmatprep.subr.msk.bf16.mxu0 %vm211_vm2, %v520_v34  ;;  %456 = vmatprep.mubr.bf16.mxu0 %v1709_v1  ;;  %v621_v35 = vpop.permute.xlu0 %620  ;;  %v623_v39 = vpop.permute.xlu1 %622 }
  0xcc   : > { %1376 = vmatprep.mubr.msk.bf16.mxu1 %vm1710_vm0, %v1708_v0  ;;  %1380 = vmatprep.subr.bf16.mxu1 %v1708_v0  ;;  %v629_v47 = vsel %vm628_vm6, %v621_v35, %v623_v39 }
  0xcd   : > { %v636_v52 = vsel %vm211_vm2, %v629_v47, 0 }
  0xcf   : > { %v625_v40 = vpop.permute.xlu0 %624  ;;  %v627_v46 = vpop.permute.xlu1 %626 }
  0xd0   : > { %v630_v44 = vsel %vm628_vm6, %v623_v39, %v625_v40  ;;  %v631_v48 = vsel %vm628_vm6, %v625_v40, %v627_v46 }
  0xd1   : > { %v642_v53 = vsel %vm211_vm2, %v631_v48, 0 }
  0xd3   : > { %v731_v45 = vpop.permute.xlu0 %730  ;;  %v733_v49 = vpop.permute.xlu1 %732 }
  0xd4   : > { %v739_v57 = vsel %vm738_vm7, %v731_v45, %v733_v49 }
  0xd5   : > { %1311 = vmatmul.mubr.msk.bf16.vlgmr.msra.gmra.mrb[0].mxu0 %vm207_vm3, %v1309_v41  ;;  %1377 = vmatmul.mubr.msk.bf16.vlgmr.msra.gmra.mrb[0].mxu1 %vm207_vm3, %v1309_v41  ;;  %v746_v62 = vsel %vm211_vm2, %v739_v57, 0 }
  0xd6   : > { %535 = vmatpush1.bf16.msra.mxu0 %v526_v42  ;;  %1381 = vmatpush3.bf16.msra.mxu1 %v532_v43 }
  0xd7   : > { %1318 = vmatprep.subr.msk.bf16.mxu0 %vm211_vm2, %v630_v44  ;;  %566 = vmatprep.mubr.bf16.mxu0 %v1709_v1  ;;  %v735_v50 = vpop.permute.xlu0 %734  ;;  %v737_v56 = vpop.permute.xlu1 %736 }
  0xd8   : > { %1382 = vmatprep.mubr.msk.bf16.mxu1 %vm1710_vm0, %v1708_v0  ;;  %1386 = vmatprep.subr.bf16.mxu1 %v1708_v0  ;;  %v740_v54 = vsel %vm738_vm7, %v733_v49, %v735_v50  ;;  %v741_v58 = vsel %vm738_vm7, %v735_v50, %v737_v56 }
  0xd9   : > { %v752_v63 = vsel %vm211_vm2, %v741_v58, 0 }
  0xdb   : > { %v841_v55 = vpop.permute.xlu0 %840  ;;  %v843_v59 = vpop.permute.xlu1 %842 }
  0xdc   : > { %v849_v5 = vsel %vm848_vm8, %v841_v55, %v843_v59 }
  0xdd   : > { %v856_v10 = vsel %vm211_vm2, %v849_v5, 0 }
  0xdf   : > { %v845_v60 = vpop.permute.xlu0 %844  ;;  %v847_v4 = vpop.permute.xlu1 %846 }
  0xe0   : > { %v850_v2 = vsel %vm848_vm8, %v843_v59, %v845_v60  ;;  %v851_v6 = vsel %vm848_vm8, %v845_v60, %v847_v4 }
  0xe1   : > { %1315 = vmatmul.mubr.msk.bf16.vlgmr.msra.gmra.mrb[0].mxu0 %vm207_vm3, %v1313_v51  ;;  %1383 = vmatmul.mubr.msk.bf16.vlgmr.msra.gmra.mrb[0].mxu1 %vm207_vm3, %v1313_v51  ;;  %v862_v11 = vsel %vm211_vm2, %v851_v6, 0 }
  0xe2   : > { %645 = vmatpush1.bf16.msra.mxu0 %v636_v52  ;;  %1387 = vmatpush3.bf16.msra.mxu1 %v642_v53 }
  0xe3   : > { %1322 = vmatprep.subr.msk.bf16.mxu0 %vm211_vm2, %v740_v54  ;;  %676 = vmatprep.mubr.bf16.mxu0 %v1709_v1  ;;  %v951_v3 = vpop.permute.xlu0 %950  ;;  %v953_v7 = vpop.permute.xlu1 %952 }
  0xe4   : > { %1388 = vmatprep.mubr.msk.bf16.mxu1 %vm1710_vm0, %v1708_v0  ;;  %1392 = vmatprep.subr.bf16.mxu1 %v1708_v0  ;;  %v959_v15 = vsel %vm958_vm9, %v951_v3, %v953_v7 }
  0xe5   : > { %v966_v20 = vsel %vm211_vm2, %v959_v15, 0 }
  0xe7   : > { %v955_v8 = vpop.permute.xlu0 %954  ;;  %v957_v14 = vpop.permute.xlu1 %956 }
  0xe8   : > { %v960_v12 = vsel %vm958_vm9, %v953_v7, %v955_v8  ;;  %v961_v16 = vsel %vm958_vm9, %v955_v8, %v957_v14 }
  0xe9   : > { %v972_v21 = vsel %vm211_vm2, %v961_v16, 0 }
  0xeb   : > { %v1061_v13 = vpop.permute.xlu0 %1060  ;;  %v1063_v17 = vpop.permute.xlu1 %1062 }
  0xec   : > { %v1069_v24 = vsel %vm1068_vm10, %v1061_v13, %v1063_v17 }
  0xed   : > { %1319 = vmatmul.mubr.msk.bf16.vlgmr.msra.gmra.mrb[0].mxu0 %vm207_vm3, %v1317_v61  ;;  %1389 = vmatmul.mubr.msk.bf16.vlgmr.msra.gmra.mrb[0].mxu1 %vm207_vm3, %v1317_v61  ;;  %v1076_v27 = vsel %vm211_vm2, %v1069_v24, 0 }
  0xee   : > { %755 = vmatpush1.bf16.msra.mxu0 %v746_v62  ;;  %1393 = vmatpush3.bf16.msra.mxu1 %v752_v63 }
  0xef   : > { %1326 = vmatprep.subr.msk.bf16.mxu0 %vm211_vm2, %v850_v2  ;;  %786 = vmatprep.mubr.bf16.mxu0 %v1709_v1  ;;  %v1065_v18 = vpop.permute.xlu0 %1064  ;;  %v1067_v23 = vpop.permute.xlu1 %1066 }
  0xf0   : > { %1394 = vmatprep.mubr.msk.bf16.mxu1 %vm1710_vm0, %v1708_v0  ;;  %1398 = vmatprep.subr.bf16.mxu1 %v1708_v0  ;;  %v1070_v22 = vsel %vm1068_vm10, %v1063_v17, %v1065_v18  ;;  %v1071_v25 = vsel %vm1068_vm10, %v1065_v18, %v1067_v23 }
  0xf1   : > { %v1082_v28 = vsel %vm211_vm2, %v1071_v25, 0 }
  0xf9   : > { %1323 = vmatmul.mubr.msk.bf16.vlgmr.msra.gmra.mrb[0].mxu0 %vm207_vm3, %v1321_v9  ;;  %1395 = vmatmul.mubr.msk.bf16.vlgmr.msra.gmra.mrb[0].mxu1 %vm207_vm3, %v1321_v9 }
  0xfa   : > { %865 = vmatpush1.bf16.msra.mxu0 %v856_v10  ;;  %1399 = vmatpush3.bf16.msra.mxu1 %v862_v11 }
  0xfb   : > { %1330 = vmatprep.subr.msk.bf16.mxu0 %vm211_vm2, %v960_v12  ;;  %896 = vmatprep.mubr.bf16.mxu0 %v1709_v1 }
  0xfc   : > { %1400 = vmatprep.mubr.msk.bf16.mxu1 %vm1710_vm0, %v1708_v0  ;;  %1404 = vmatprep.subr.bf16.mxu1 %v1708_v0 }
 0x105   : > { %1327 = vmatmul.mubr.msk.bf16.vlgmr.msra.gmra.mrb[0].mxu0 %vm207_vm3, %v1325_v19  ;;  %1401 = vmatmul.mubr.msk.bf16.vlgmr.msra.gmra.mrb[0].mxu1 %vm207_vm3, %v1325_v19 }
 0x106   : > { %975 = vmatpush1.bf16.msra.mxu0 %v966_v20  ;;  %1405 = vmatpush3.bf16.msra.mxu1 %v972_v21 }
 0x107   : > { %1334 = vmatprep.subr.msk.bf16.mxu0 %vm211_vm2, %v1070_v22  ;;  %1006 = vmatprep.mubr.bf16.mxu0 %v1709_v1 }
 0x108   : > { %1406 = vmatprep.mubr.msk.bf16.mxu1 %vm1710_vm0, %v1708_v0  ;;  %1410 = vmatprep.subr.bf16.mxu1 %v1708_v0 }
 0x111   : > { %1331 = vmatmul.mubr.msk.bf16.vlgmr.msra.gmra.mrb[0].mxu0 %vm207_vm3, %v1329_v26  ;;  %1407 = vmatmul.mubr.msk.bf16.vlgmr.msra.gmra.mrb[0].mxu1 %vm207_vm3, %v1329_v26 }
 0x112   : > { %1085 = vmatpush1.bf16.msra.mxu0 %v1076_v27  ;;  %1411 = vmatpush3.bf16.msra.mxu1 %v1082_v28 }
 0x113   : > { %1116 = vmatprep.mubr.bf16.mxu0 %v1709_v1  ;;  %1412 = vmatprep.mubr.msk.bf16.mxu1 %vm1710_vm0, %v1708_v0 }
 0x11d   : > { %1335 = vmatmul.mubr.msk.bf16.vlgmr.msra.gmra.mrb[0].mxu0 %vm207_vm3, %v1333_v29  ;;  %1413 = vmatmul.mubr.msk.bf16.vlgmr.msra.gmra.mrb[0].mxu1 %vm207_vm3, %v1333_v29 }
 0x1f0   : > { %v1118_v1 = vpop.f32.mrb[0].mxu0  ;;  %v1159_v30 = vpop.f32.mrb[0].mxu1 }
 0x1f1   : > { %v1343_v0 = vpack.c.bf16 %v1159_v30, %v1159_v30  ;;  %v1120_v31 = vpop.f32.mrb[1].mxu0  ;;  %v1414_v32 = vpop.f32.mrb[1].mxu1 }
 0x1f2   : > { %v1342_v33 = vpack.c.bf16 %v1120_v31, %v1118_v1  ;;  %v1122_v34 = vpop.f32.mrb[2].mxu0  ;;  %v1162_v35 = vpop.f32.mrb[2].mxu1 }
 0x1f3   : > { %1182 = vst [vmem:[%s177_s21 + $0x8] sm:$0xf] %v1343_v0  ;;  %v1123_v36 = vpop.f32.mrb[3].mxu0  ;;  %v1415_v37 = vpop.f32.mrb[3].mxu1 }
 0x1f4   : > { %1181 = vst [vmem:[%s177_s21] sm:$0xff] %v1342_v33 }
 0x1f5   : > { %1620 = shalt.err (!%p1617_p5)
}
 0x1f6   : > { %s1621_s3 = scalar_lea.hbm %s2007_s29, 192  ;;  %s1625_s5 = scalar_lea.hbm %s2063_s2, 1536 }
 0x1f7   : > { %p1622_p7 = scmp.ne.s32.totalorder %s2007_s29, %s1621_s3  ;;  %p1626_p1 = scmp.lt.u32.totalorder %s2007_s29, %s2063_s2 }
 0x1f8   : > { %p1627_p2 = scmp.lt.u32.totalorder %s1625_s5, %s1621_s3  ;;  %p1629_p8 = scmp.lt.u32.totalorder %s1621_s3, %s2007_s29 }
 0x1f9   : > { %p1623_p10 = pnand %p1622_p7, %p2072_p9 }
 0x1fa   : > { %p1628_p3 = por %p1627_p2, %p1626_p1 }
 0x1fb   : > { %p1624_p11 = pneg %p1623_p10 }
 0x1fc   : > { %p1630_p12 = por %p1629_p8, %p1628_p3 }
 0x1fe   : > { %p1631_p0 = pnand %p1630_p12, %p1624_p11 }
 0x200   : > { %1634 = shalt.err (!%p1631_p0)
}
 0x201   : > { %1485 = dma.vmem_to_hbm [thread:$0]  (%p2072_p9), %s2009_s27, 192, %s2007_s29, %s1184_s12  }
 0x202 PF: > { %p1496_p6 = scmp.ge.s32.totalorder %s1705_s16, 2  ;;  %s1212_s18 = sand.u32 1, %s1677_s9  }
 0x203   : > { %p2073_p13 = scmp.ne.s32.totalorder %s2068_s28, 0  ;;  %s1213_s21 = scalar_lea.sflag [#allocation4], %s1212_s18 }
 0x205   : > { %p1492_p4 = pnand %p1496_p6, %p2073_p13 }
 0x207   : > { %1672 = dma.done.wait (!%p1492_p4), %s1213_s21, 192  }
 0x208   : > { %1674 = vsyncadd (!%p1492_p4), %s1213_s21, 4294967104  ;;  %s18_s16 = sadd.s32 1, %s1705_s16   ;;  %s2074_s9 = smov %s1681_s10 }
 0x209   : > { %p15_p5 = scmp.ge.s32.totalorder %s18_s16, 10   ;;  %s2075_s10 = smov %s1685_s11 }
 0x20a   : > { %s2076_s11 = smov %s1813_s30  ;;  %s2077_s12 = smov %s1697_s14 }
 0x20b   : > { %s2078_s13 = smov %s1701_s15  ;;  %s2079_s14 = smov %s2082_s19 }
 0x20c   : > { %s2080_s15 = smov %s2086_s20  ;;  %17 = sbr.rel (!%p15_p5) target bundleno = 7 (0x7), region = 81 }
 0x213   :  { %1218 = vsyncpa [#allocation3], 1 }
 0x214   :  { %1220 = vsyncpa [#allocation3 + $0x1], 1 }
 0x215   :  { %1221 = vsyncpa [#allocation4], 1 }
 0x216   :  { %1223 = vsyncpa [#allocation4 + $0x1], 1 }

</bundles_post_ra>
